<compile_context>
chip_gen: v5e
topology: v5e:2x2
jax: 0.10.0
libtpu: 0.0.40
codegen_flags: <defaults>
</compile_context>

<pallas_src>
import functools

import jax
import jax.numpy as jnp
from jax.experimental import pallas as pl
from jax.experimental.pallas import tpu as pltpu


def _dice_kernel(x_ref, t_ref, o_ref, tps_ref, den_ref, *, num_classes, eps):
    """Grid = (N, rows // TR).

    x_ref:  (1, C, TR, 128) float32 logits
    t_ref:  (1, 1, TR, 128) int32 class labels
    o_ref:  (1, 1, 1) float32 mean dice over classes 1..C-1
    tps_ref/den_ref: (C-1, TR, 128) float32 elementwise partial-count accumulators.
    """
    s = pl.program_id(1)
    C = num_classes

    @pl.when(s == 0)
    def _init():
        tps_ref[...] = jnp.zeros_like(tps_ref)
        den_ref[...] = jnp.zeros_like(den_ref)

    x = x_ref[0]       # (C, TR, 128) float32 logits
    t = t_ref[0, 0]    # (TR, 128) int32 labels

    # argmax over the channel axis.  softmax is monotone per pixel, so
    # argmax(softmax(x)) == argmax(x); strict '>' keeps the first max on ties
    # (matches torch.argmax tie-breaking toward the lower index).
    best = x[0]                          # (TR, 128)
    pred = jnp.zeros_like(t)             # (TR, 128) int32
    for c in range(1, C):
        v = x[c]
        better = v > best
        best = jnp.where(better, v, best)
        pred = jnp.where(better, jnp.int32(c), pred)

    # Per-class elementwise partial counts.  Purely VPU work; the cross-lane
    # reduction is deferred to the epilogue.  Class 0 is skipped entirely.
    # NOTE: f32 counts lose exactness past ~2^24 pixels per class per image.
    for c in range(1, C):
        p_f = (pred == c).astype(jnp.float32)   # predicted one-hot, class c
        t_f = (t == c).astype(jnp.float32)      # target one-hot, class c
        tps_ref[c - 1] += p_f * t_f             # true positives
        den_ref[c - 1] += p_f + t_f             # pred count + target count

    @pl.when(s == pl.num_programs(1) - 1)
    def _finalize():
        # Reduce lanes, then sublanes -> (C-1, 1) per-class totals (paid once).
        tps = jnp.sum(jnp.sum(tps_ref[...], axis=2), axis=1, keepdims=True)
        den = jnp.sum(jnp.sum(den_ref[...], axis=2), axis=1, keepdims=True)
        # 2*tps + fps + fns == pc + tc == den
        dice = 2.0 * tps / (den + eps)                           # (C-1, 1)
        o_ref[0] = jnp.sum(dice, axis=0, keepdims=True) / float(C - 1)


def _round_up(a, b):
    return (a + b - 1) // b * b


def _choose_tile_rows(rows, num_classes, vmem_budget_bytes):
    """Pick TR (rows of 128 pixels per grid step) so the double-buffered input
    blocks plus the accumulator scratch stay inside `vmem_budget_bytes`."""
    c = num_classes
    per_row = (2 * c * 128 * 4            # double-buffered logits block
               + 2 * 128 * 4              # double-buffered labels block
               + 2 * (c - 1) * 128 * 4)   # tps/den accumulators
    max_rows = max(8, (vmem_budget_bytes // per_row) // 8 * 8)
    return min(_round_up(rows, 8), max_rows)


def dice_metric(inputs, targets, eps=1e-5, vmem_budget_bytes=8 << 20):
    """Pallas equivalent of Dice_metric.forward(inputs, targets, logits=True)."""
    # TODO(synk): the logits=False path (pre-discretized integer predictions) is not implemented.
    N, C, H, W = inputs.shape
    assert C >= 2, "Dice_metric drops class 0; requires at least 2 classes"

    S = H * W
    rows_raw = pl.cdiv(S, 128)
    TR = _choose_tile_rows(rows_raw, C, vmem_budget_bytes)
    rows = _round_up(rows_raw, TR)
    S_pad = rows * 128

    x = inputs.astype(jnp.float32).reshape(N, C, S)
    t = targets.astype(jnp.int32).reshape(N, S)
    if S_pad != S:
        # Padded pixels: all-zero logits -> argmax picks class 0; label 0.
        # Neither contributes to any class in 1..C-1, so results are unchanged.
        x = jnp.pad(x, ((0, 0), (0, 0), (0, S_pad - S)))
        t = jnp.pad(t, ((0, 0), (0, S_pad - S)))
    x = x.reshape(N, C, rows, 128)
    t = t.reshape(N, 1, rows, 128)

    kernel = functools.partial(_dice_kernel, num_classes=C, eps=float(eps))

    out = pl.pallas_call(
        kernel,
        out_shape=jax.ShapeDtypeStruct((N, 1, 1), jnp.float32),
        grid_spec=pltpu.PrefetchScalarGridSpec(
            num_scalar_prefetch=0,
            grid=(N, rows // TR),
            in_specs=[
                pl.BlockSpec((1, C, TR, 128), lambda n, s: (n, 0, s, 0)),
                pl.BlockSpec((1, 1, TR, 128), lambda n, s: (n, 0, s, 0)),
            ],
            out_specs=pl.BlockSpec((1, 1, 1), lambda n, s: (n, 0, 0)),
            scratch_shapes=[
                pltpu.VMEM((C - 1, TR, 128), jnp.float32),   # tps accumulator
                pltpu.VMEM((C - 1, TR, 128), jnp.float32),   # pred+target count accumulator
            ],
        ),
        compiler_params=pltpu.CompilerParams(
            dimension_semantics=("parallel", "arbitrary")),
    )(x, t)
    return out.reshape(N)


def dice_metric_ref(inputs, targets, eps=1e-5):
    """Pure-JAX reference mirroring the PyTorch module (logits=True)."""
    C = inputs.shape[1]
    pred = jnp.argmax(jax.nn.softmax(inputs, axis=1), axis=1)
    pred_oh = jax.nn.one_hot(pred, C, axis=1, dtype=jnp.float32)
    targ_oh = jax.nn.one_hot(targets, C, axis=1, dtype=jnp.float32)
    dims = (2, 3)
    tps = jnp.sum(pred_oh * targ_oh, dims)
    fps = jnp.sum(pred_oh * (1.0 - targ_oh), dims)
    fns = jnp.sum((1.0 - pred_oh) * targ_oh, dims)
    loss = 2.0 * tps / (2.0 * tps + fps + fns + eps)
    return loss[:, 1:].mean(axis=1)


if __name__ == "__main__":
    N, C, H, W = 2, 4, 16, 16
    key = jax.random.PRNGKey(0)
    k1, k2 = jax.random.split(key)
    inputs = jax.random.normal(k1, (N, C, H, W), dtype=jnp.float32)   # logits
    targets = jax.random.randint(k2, (N, H, W), 0, C, dtype=jnp.int32)

    out = dice_metric(inputs, targets)
    out = jax.block_until_ready(out)

    ref = dice_metric_ref(inputs, targets)
    assert out.shape == (N,)
    assert jnp.allclose(out, ref, rtol=1e-5, atol=1e-5), (out, ref)
    print("KERNEL_OK")
</pallas_src>

<mosaic_0001>
module attributes {stable_mosaic.version = 11 : i64} {
  func.func @_dice_kernel(%arg0: i32, %arg1: i32, %arg2: memref<1x4x8x128xf32, #tpu.memory_space<vmem>>, %arg3: memref<1x1x8x128xi32, #tpu.memory_space<vmem>>, %arg4: memref<1x1x1xf32, #tpu.memory_space<vmem>>, %arg5: memref<3x8x128xf32, #tpu.memory_space<vmem>>, %arg6: memref<3x8x128xf32, #tpu.memory_space<vmem>>) attributes {dimension_semantics = [#tpu.dimension_semantics<parallel>, #tpu.dimension_semantics<arbitrary>], iteration_bounds = array<i64: 2, 1>, scalar_prefetch = 0 : i64, scratch_operands = 2 : i64, tpu.core_type = #tpu.core_type<tc>, window_params = [{transform_indices = @transform_0, window_bounds = array<i64: 1, 4, 8, 128>}, {transform_indices = @transform_1, window_bounds = array<i64: 1, 1, 8, 128>}, {transform_indices = @transform_2, window_bounds = array<i64: 1, 1, 1>}]} {
    %c0_i32 = arith.constant 0 : i32
    %0 = arith.cmpi eq, %arg1, %c0_i32 : i32
    %1 = arith.extui %0 : i1 to i32
    %c0_i32_0 = arith.constant 0 : i32
    %2 = arith.cmpi ne, %1, %c0_i32_0 : i32
    scf.if %2 {
      %cst = arith.constant 0.000000e+00 : f32
      %96 = vector.broadcast %cst : f32 to vector<3x8x128xf32>
      %c0_51 = arith.constant 0 : index
      %c0_52 = arith.constant 0 : index
      %c0_53 = arith.constant 0 : index
      %97 = vector.load %arg5[%c0_51, %c0_52, %c0_53] : memref<3x8x128xf32, #tpu.memory_space<vmem>>, vector<3x8x128xf32>
      tpu.vector_store %arg5[%c0_51, %c0_52, %c0_53], %96 {strides = array<i32>} : memref<3x8x128xf32, #tpu.memory_space<vmem>>, vector<3x8x128xf32>,
      %cst_54 = arith.constant 0.000000e+00 : f32
      %98 = vector.broadcast %cst_54 : f32 to vector<3x8x128xf32>
      %c0_55 = arith.constant 0 : index
      %c0_56 = arith.constant 0 : index
      %c0_57 = arith.constant 0 : index
      %99 = vector.load %arg6[%c0_55, %c0_56, %c0_57] : memref<3x8x128xf32, #tpu.memory_space<vmem>>, vector<3x8x128xf32>
      tpu.vector_store %arg6[%c0_55, %c0_56, %c0_57], %98 {strides = array<i32>} : memref<3x8x128xf32, #tpu.memory_space<vmem>>, vector<3x8x128xf32>,
    } else {
    }
    %c0 = arith.constant 0 : index
    %c0_1 = arith.constant 0 : index
    %c0_2 = arith.constant 0 : index
    %c0_3 = arith.constant 0 : index
    %3 = vector.load %arg2[%c0, %c0_1, %c0_2, %c0_3] : memref<1x4x8x128xf32, #tpu.memory_space<vmem>>, vector<1x4x8x128xf32>
    %4 = vector.shape_cast %3 : vector<1x4x8x128xf32> to vector<4x8x128xf32>
    %c0_4 = arith.constant 0 : index
    %c0_5 = arith.constant 0 : index
    %c0_6 = arith.constant 0 : index
    %c0_7 = arith.constant 0 : index
    %5 = vector.load %arg3[%c0_4, %c0_5, %c0_6, %c0_7] : memref<1x1x8x128xi32, #tpu.memory_space<vmem>>, vector<1x1x8x128xi32>
    %6 = vector.shape_cast %5 : vector<1x1x8x128xi32> to vector<8x128xi32>
    %7 = vector.extract_strided_slice %4 {offsets = [0, 0, 0], sizes = [1, 8, 128], strides = [1, 1, 1]} : vector<4x8x128xf32> to vector<1x8x128xf32>
    %8 = vector.shape_cast %7 : vector<1x8x128xf32> to vector<8x128xf32>
    %c0_i32_8 = arith.constant 0 : i32
    %9 = vector.broadcast %c0_i32_8 : i32 to vector<8x128xi32>
    %10 = vector.extract_strided_slice %4 {offsets = [1, 0, 0], sizes = [1, 8, 128], strides = [1, 1, 1]} : vector<4x8x128xf32> to vector<1x8x128xf32>
    %11 = vector.shape_cast %10 : vector<1x8x128xf32> to vector<8x128xf32>
    %12 = arith.cmpf ogt, %11, %8 : vector<8x128xf32>
    %13 = arith.select %12, %11, %8 : vector<8x128xi1>, vector<8x128xf32>
    %c1_i32 = arith.constant 1 : i32
    %14 = vector.broadcast %c1_i32 : i32 to vector<8x128xi32>
    %15 = arith.select %12, %14, %9 : vector<8x128xi1>, vector<8x128xi32>
    %16 = vector.extract_strided_slice %4 {offsets = [2, 0, 0], sizes = [1, 8, 128], strides = [1, 1, 1]} : vector<4x8x128xf32> to vector<1x8x128xf32>
    %17 = vector.shape_cast %16 : vector<1x8x128xf32> to vector<8x128xf32>
    %18 = arith.cmpf ogt, %17, %13 : vector<8x128xf32>
    %19 = arith.select %18, %17, %13 : vector<8x128xi1>, vector<8x128xf32>
    %c2_i32 = arith.constant 2 : i32
    %20 = vector.broadcast %c2_i32 : i32 to vector<8x128xi32>
    %21 = arith.select %18, %20, %15 : vector<8x128xi1>, vector<8x128xi32>
    %22 = vector.extract_strided_slice %4 {offsets = [3, 0, 0], sizes = [1, 8, 128], strides = [1, 1, 1]} : vector<4x8x128xf32> to vector<1x8x128xf32>
    %23 = vector.shape_cast %22 : vector<1x8x128xf32> to vector<8x128xf32>
    %24 = arith.cmpf ogt, %23, %19 : vector<8x128xf32>
    %c3_i32 = arith.constant 3 : i32
    %25 = vector.broadcast %c3_i32 : i32 to vector<8x128xi32>
    %26 = arith.select %24, %25, %21 : vector<8x128xi1>, vector<8x128xi32>
    %c1_i32_9 = arith.constant 1 : i32
    %27 = vector.broadcast %c1_i32_9 : i32 to vector<8x128xi32>
    %28 = arith.cmpi eq, %26, %27 : vector<8x128xi32>
    %29 = arith.extui %28 : vector<8x128xi1> to vector<8x128xi32>
    %30 = arith.sitofp %29 : vector<8x128xi32> to vector<8x128xf32>
    %c1_i32_10 = arith.constant 1 : i32
    %31 = vector.broadcast %c1_i32_10 : i32 to vector<8x128xi32>
    %32 = arith.cmpi eq, %6, %31 : vector<8x128xi32>
    %33 = arith.extui %32 : vector<8x128xi1> to vector<8x128xi32>
    %34 = arith.sitofp %33 : vector<8x128xi32> to vector<8x128xf32>
    %c0_11 = arith.constant 0 : index
    %c0_12 = arith.constant 0 : index
    %c0_13 = arith.constant 0 : index
    %35 = vector.load %arg5[%c0_11, %c0_12, %c0_13] : memref<3x8x128xf32, #tpu.memory_space<vmem>>, vector<1x8x128xf32>
    %36 = vector.shape_cast %35 : vector<1x8x128xf32> to vector<8x128xf32>
    %37 = arith.mulf %30, %34 : vector<8x128xf32>
    %38 = arith.addf %36, %37 : vector<8x128xf32>
    %c0_14 = arith.constant 0 : index
    %c0_15 = arith.constant 0 : index
    %c0_16 = arith.constant 0 : index
    %39 = vector.load %arg5[%c0_14, %c0_15, %c0_16] : memref<3x8x128xf32, #tpu.memory_space<vmem>>, vector<1x8x128xf32>
    %40 = vector.shape_cast %39 : vector<1x8x128xf32> to vector<8x128xf32>
    %41 = vector.shape_cast %38 : vector<8x128xf32> to vector<1x8x128xf32>
    tpu.vector_store %arg5[%c0_14, %c0_15, %c0_16], %41 {strides = array<i32>} : memref<3x8x128xf32, #tpu.memory_space<vmem>>, vector<1x8x128xf32>,
    %c0_17 = arith.constant 0 : index
    %c0_18 = arith.constant 0 : index
    %c0_19 = arith.constant 0 : index
    %42 = vector.load %arg6[%c0_17, %c0_18, %c0_19] : memref<3x8x128xf32, #tpu.memory_space<vmem>>, vector<1x8x128xf32>
    %43 = vector.shape_cast %42 : vector<1x8x128xf32> to vector<8x128xf32>
    %44 = arith.addf %30, %34 : vector<8x128xf32>
    %45 = arith.addf %43, %44 : vector<8x128xf32>
    %c0_20 = arith.constant 0 : index
    %c0_21 = arith.constant 0 : index
    %c0_22 = arith.constant 0 : index
    %46 = vector.load %arg6[%c0_20, %c0_21, %c0_22] : memref<3x8x128xf32, #tpu.memory_space<vmem>>, vector<1x8x128xf32>
    %47 = vector.shape_cast %46 : vector<1x8x128xf32> to vector<8x128xf32>
    %48 = vector.shape_cast %45 : vector<8x128xf32> to vector<1x8x128xf32>
    tpu.vector_store %arg6[%c0_20, %c0_21, %c0_22], %48 {strides = array<i32>} : memref<3x8x128xf32, #tpu.memory_space<vmem>>, vector<1x8x128xf32>,
    %c2_i32_23 = arith.constant 2 : i32
    %49 = vector.broadcast %c2_i32_23 : i32 to vector<8x128xi32>
    %50 = arith.cmpi eq, %26, %49 : vector<8x128xi32>
    %51 = arith.extui %50 : vector<8x128xi1> to vector<8x128xi32>
    %52 = arith.sitofp %51 : vector<8x128xi32> to vector<8x128xf32>
    %c2_i32_24 = arith.constant 2 : i32
    %53 = vector.broadcast %c2_i32_24 : i32 to vector<8x128xi32>
    %54 = arith.cmpi eq, %6, %53 : vector<8x128xi32>
    %55 = arith.extui %54 : vector<8x128xi1> to vector<8x128xi32>
    %56 = arith.sitofp %55 : vector<8x128xi32> to vector<8x128xf32>
    %c1 = arith.constant 1 : index
    %c0_25 = arith.constant 0 : index
    %c0_26 = arith.constant 0 : index
    %57 = vector.load %arg5[%c1, %c0_25, %c0_26] : memref<3x8x128xf32, #tpu.memory_space<vmem>>, vector<1x8x128xf32>
    %58 = vector.shape_cast %57 : vector<1x8x128xf32> to vector<8x128xf32>
    %59 = arith.mulf %52, %56 : vector<8x128xf32>
    %60 = arith.addf %58, %59 : vector<8x128xf32>
    %c1_27 = arith.constant 1 : index
    %c0_28 = arith.constant 0 : index
    %c0_29 = arith.constant 0 : index
    %61 = vector.load %arg5[%c1_27, %c0_28, %c0_29] : memref<3x8x128xf32, #tpu.memory_space<vmem>>, vector<1x8x128xf32>
    %62 = vector.shape_cast %61 : vector<1x8x128xf32> to vector<8x128xf32>
    %63 = vector.shape_cast %60 : vector<8x128xf32> to vector<1x8x128xf32>
    tpu.vector_store %arg5[%c1_27, %c0_28, %c0_29], %63 {strides = array<i32>} : memref<3x8x128xf32, #tpu.memory_space<vmem>>, vector<1x8x128xf32>,
    %c1_30 = arith.constant 1 : index
    %c0_31 = arith.constant 0 : index
    %c0_32 = arith.constant 0 : index
    %64 = vector.load %arg6[%c1_30, %c0_31, %c0_32] : memref<3x8x128xf32, #tpu.memory_space<vmem>>, vector<1x8x128xf32>
    %65 = vector.shape_cast %64 : vector<1x8x128xf32> to vector<8x128xf32>
    %66 = arith.addf %52, %56 : vector<8x128xf32>
    %67 = arith.addf %65, %66 : vector<8x128xf32>
    %c1_33 = arith.constant 1 : index
    %c0_34 = arith.constant 0 : index
    %c0_35 = arith.constant 0 : index
    %68 = vector.load %arg6[%c1_33, %c0_34, %c0_35] : memref<3x8x128xf32, #tpu.memory_space<vmem>>, vector<1x8x128xf32>
    %69 = vector.shape_cast %68 : vector<1x8x128xf32> to vector<8x128xf32>
    %70 = vector.shape_cast %67 : vector<8x128xf32> to vector<1x8x128xf32>
    tpu.vector_store %arg6[%c1_33, %c0_34, %c0_35], %70 {strides = array<i32>} : memref<3x8x128xf32, #tpu.memory_space<vmem>>, vector<1x8x128xf32>,
    %c3_i32_36 = arith.constant 3 : i32
    %71 = vector.broadcast %c3_i32_36 : i32 to vector<8x128xi32>
    %72 = arith.cmpi eq, %26, %71 : vector<8x128xi32>
    %73 = arith.extui %72 : vector<8x128xi1> to vector<8x128xi32>
    %74 = arith.sitofp %73 : vector<8x128xi32> to vector<8x128xf32>
    %c3_i32_37 = arith.constant 3 : i32
    %75 = vector.broadcast %c3_i32_37 : i32 to vector<8x128xi32>
    %76 = arith.cmpi eq, %6, %75 : vector<8x128xi32>
    %77 = arith.extui %76 : vector<8x128xi1> to vector<8x128xi32>
    %78 = arith.sitofp %77 : vector<8x128xi32> to vector<8x128xf32>
    %c2 = arith.constant 2 : index
    %c0_38 = arith.constant 0 : index
    %c0_39 = arith.constant 0 : index
    %79 = vector.load %arg5[%c2, %c0_38, %c0_39] : memref<3x8x128xf32, #tpu.memory_space<vmem>>, vector<1x8x128xf32>
    %80 = vector.shape_cast %79 : vector<1x8x128xf32> to vector<8x128xf32>
    %81 = arith.mulf %74, %78 : vector<8x128xf32>
    %82 = arith.addf %80, %81 : vector<8x128xf32>
    %c2_40 = arith.constant 2 : index
    %c0_41 = arith.constant 0 : index
    %c0_42 = arith.constant 0 : index
    %83 = vector.load %arg5[%c2_40, %c0_41, %c0_42] : memref<3x8x128xf32, #tpu.memory_space<vmem>>, vector<1x8x128xf32>
    %84 = vector.shape_cast %83 : vector<1x8x128xf32> to vector<8x128xf32>
    %85 = vector.shape_cast %82 : vector<8x128xf32> to vector<1x8x128xf32>
    tpu.vector_store %arg5[%c2_40, %c0_41, %c0_42], %85 {strides = array<i32>} : memref<3x8x128xf32, #tpu.memory_space<vmem>>, vector<1x8x128xf32>,
    %c2_43 = arith.constant 2 : index
    %c0_44 = arith.constant 0 : index
    %c0_45 = arith.constant 0 : index
    %86 = vector.load %arg6[%c2_43, %c0_44, %c0_45] : memref<3x8x128xf32, #tpu.memory_space<vmem>>, vector<1x8x128xf32>
    %87 = vector.shape_cast %86 : vector<1x8x128xf32> to vector<8x128xf32>
    %88 = arith.addf %74, %78 : vector<8x128xf32>
    %89 = arith.addf %87, %88 : vector<8x128xf32>
    %c2_46 = arith.constant 2 : index
    %c0_47 = arith.constant 0 : index
    %c0_48 = arith.constant 0 : index
    %90 = vector.load %arg6[%c2_46, %c0_47, %c0_48] : memref<3x8x128xf32, #tpu.memory_space<vmem>>, vector<1x8x128xf32>
    %91 = vector.shape_cast %90 : vector<1x8x128xf32> to vector<8x128xf32>
    %92 = vector.shape_cast %89 : vector<8x128xf32> to vector<1x8x128xf32>
    tpu.vector_store %arg6[%c2_46, %c0_47, %c0_48], %92 {strides = array<i32>} : memref<3x8x128xf32, #tpu.memory_space<vmem>>, vector<1x8x128xf32>,
    %c0_i32_49 = arith.constant 0 : i32
    %93 = arith.cmpi eq, %arg1, %c0_i32_49 : i32
    %94 = arith.extui %93 : i1 to i32
    %c0_i32_50 = arith.constant 0 : i32
    %95 = arith.cmpi ne, %94, %c0_i32_50 : i32
    scf.if %95 {
      %c0_51 = arith.constant 0 : index
      %c0_52 = arith.constant 0 : index
      %c0_53 = arith.constant 0 : index
      %96 = vector.load %arg5[%c0_51, %c0_52, %c0_53] : memref<3x8x128xf32, #tpu.memory_space<vmem>>, vector<3x8x128xf32>
      %cst = arith.constant dense<0.000000e+00> : vector<3x8xf32>
      %97 = vector.multi_reduction <add>, %96, %cst [2] : vector<3x8x128xf32> to vector<3x8xf32>
      %cst_54 = arith.constant dense<0.000000e+00> : vector<3xf32>
      %98 = vector.multi_reduction <add>, %97, %cst_54 [1] : vector<3x8xf32> to vector<3xf32>
      %99 = vector.shape_cast %98 : vector<3xf32> to vector<3x1xf32>
      %c0_55 = arith.constant 0 : index
      %c0_56 = arith.constant 0 : index
      %c0_57 = arith.constant 0 : index
      %100 = vector.load %arg6[%c0_55, %c0_56, %c0_57] : memref<3x8x128xf32, #tpu.memory_space<vmem>>, vector<3x8x128xf32>
      %cst_58 = arith.constant dense<0.000000e+00> : vector<3x8xf32>
      %101 = vector.multi_reduction <add>, %100, %cst_58 [2] : vector<3x8x128xf32> to vector<3x8xf32>
      %cst_59 = arith.constant dense<0.000000e+00> : vector<3xf32>
      %102 = vector.multi_reduction <add>, %101, %cst_59 [1] : vector<3x8xf32> to vector<3xf32>
      %103 = vector.shape_cast %102 : vector<3xf32> to vector<3x1xf32>
      %cst_60 = arith.constant 2.000000e+00 : f32
      %104 = vector.broadcast %cst_60 : f32 to vector<3x1xf32>
      %105 = arith.mulf %104, %99 : vector<3x1xf32>
      %cst_61 = arith.constant 9.99999974E-6 : f32
      %106 = vector.broadcast %cst_61 : f32 to vector<3x1xf32>
      %107 = arith.addf %103, %106 : vector<3x1xf32>
      %108 = arith.divf %105, %107 : vector<3x1xf32>
      %cst_62 = arith.constant dense<0.000000e+00> : vector<1xf32>
      %109 = vector.multi_reduction <add>, %108, %cst_62 [0] : vector<3x1xf32> to vector<1xf32>
      %110 = vector.shape_cast %109 : vector<1xf32> to vector<1x1xf32>
      %cst_63 = arith.constant 3.000000e+00 : f32
      %111 = vector.broadcast %cst_63 : f32 to vector<1x1xf32>
      %112 = arith.divf %110, %111 : vector<1x1xf32>
      %c0_64 = arith.constant 0 : index
      %c0_65 = arith.constant 0 : index
      %c0_66 = arith.constant 0 : index
      %113 = vector.load %arg4[%c0_64, %c0_65, %c0_66] : memref<1x1x1xf32, #tpu.memory_space<vmem>>, vector<1x1x1xf32>
      %114 = vector.shape_cast %113 : vector<1x1x1xf32> to vector<1x1xf32>
      %115 = vector.shape_cast %112 : vector<1x1xf32> to vector<1x1x1xf32>
      tpu.vector_store %arg4[%c0_64, %c0_65, %c0_66], %115 {strides = array<i32>} : memref<1x1x1xf32, #tpu.memory_space<vmem>>, vector<1x1x1xf32>,
    } else {
    }
    return
  }
  func.func @transform_0(%arg0: i32, %arg1: i32) -> (i32, i32, i32, i32) {
    %c0_i32 = arith.constant 0 : i32
    %c0_i32_0 = arith.constant 0 : i32
    %c0_i32_1 = arith.constant 0 : i32
    return %arg0, %c0_i32, %arg1, %c0_i32_0 : i32, i32, i32, i32
  }
  func.func @transform_1(%arg0: i32, %arg1: i32) -> (i32, i32, i32, i32) {
    %c0_i32 = arith.constant 0 : i32
    %c0_i32_0 = arith.constant 0 : i32
    %c0_i32_1 = arith.constant 0 : i32
    return %arg0, %c0_i32, %arg1, %c0_i32_0 : i32, i32, i32, i32
  }
  func.func @transform_2(%arg0: i32, %arg1: i32) -> (i32, i32, i32) {
    %c0_i32 = arith.constant 0 : i32
    %c0_i32_0 = arith.constant 0 : i32
    %c0_i32_1 = arith.constant 0 : i32
    return %arg0, %c0_i32, %c0_i32_0 : i32, i32, i32
  }
}

</mosaic_0001>

<bundles_post_ra>
// kernel: tpu_custom_call.1
= control target key start
LH: loop header
LB: loop body
LE: loop exit
PB: predicated region body
PF: predicated region fallthrough
CT: control target
= control target key end

     0   :  { %7 = vsyncpa [#allocation5], 0  ;;  %s796_s0 = inlined_call_operand.hbm [shape: f32[2,4,8,128], index: 0, kind: input, shape index: {}]   ;;  %s797_s1 = inlined_call_operand.hbm [shape: s32[2,1,8,128], index: 1, kind: input, shape index: {}]   ;;  %s798_s2 = inlined_call_operand.vmem [shape: f32[2,1,1], index: 2, kind: output, shape index: {}]  }
   0x1   :  { %9 = vsyncpa [#allocation5 + $0x1], 0 }
   0x2   :  { %10 = vsyncpa [#allocation7], 0 }
   0x3   :  { %12 = vsyncpa [#allocation7 + $0x1], 0  ;;  %s692_s9 = smov 0   ;;  %s694_s10 = smov 0  }
   0x4   :  { %s696_s11 = smov 0   ;;  %s698_s12 = smov 0  }
   0x5   :  { %s700_s13 = smov 0   ;;  %s702_s14 = smov 0  }
   0x6 LB: > { %s466_s15 = sadd.s32 4294967295, %s670_s14   ;;  %s30_s16 = sadd.s32 1, %s666_s13  ;;  %s670_s14 = sphi %s702_s14, %s18_s14   ;;  %s666_s13 = sphi %s700_s13, %s806_s13   ;;  %s662_s12 = sphi %s698_s12, %s805_s12   ;;  %s658_s11 = sphi %s696_s11, %s804_s11   ;;  %s654_s10 = sphi %s694_s10, %s803_s10   ;;  %s650_s9 = sphi %s692_s9, %s802_s9  }
   0x7   : > { %p32_p0 = scmp.ge.s32.totalorder %s30_s16, 2  ;;  %s39_s17 = sadd.s32 1, %s658_s11 }
   0x8   : > { %p46_p1 = scmp.ne.s32.totalorder %s658_s11, %s654_s10  ;;  %p47_p2 = scmp.eq.s32.totalorder %s670_s14, 0 }
   0x9   : > { %s808_s16 = smov (%p32_p0, %s30_s16), 0  ;;  %p52_p4 = scmp.ne.s32.totalorder %s654_s10, %s650_s9 }
   0xa   : > { %p728_p3 = por %p47_p2, %p46_p1  ;;  %s34_s19 = ssub.s32 %s666_s13, %s808_s16 }
   0xb   : > { %p53_p5 = scmp.eq.s32.totalorder %s466_s15, 0  ;;  %p37_p6 = scmp.eq.s32.totalorder %s34_s19, 0 }
   0xc   : > { %p498_p8 = scmp.lt.s32.totalorder %s670_s14, 2  ;;  %s130_s22 = sand.u32 1, %s658_s11  }
   0xd   : > { %p735_p7 = por %p53_p5, %p52_p4  ;;  %s486_s23 = sshll.u32 %s666_s13, 5 }
   0xe   : > { %s741_s21 = scalar_select %p37_p6, %s658_s11, %s39_s17  }
   0xf   : > { %s470_s24 = sshll.u32 %s130_s22, 5  ;;  %s140_s27 = scalar_lea.hbm %s796_s0, %s486_s23 }
  0x10   : > { %s141_s28 = sshll.u32 %s140_s27, 4  ;;  %s134_s29 = scalar_lea.vmem [#allocation4], %s470_s24  ;;  %s142_s28 = int_to_ptr.hbm [resolvable:$true] %s141_s28 }
  0x11   : > { %s143_s30 = sshll.u32 %s134_s29, 4  ;;  %p750_p9 = pnand %p498_p8, %p728_p3  ;;  %s144_s30 = int_to_ptr.vmem [resolvable:$true] %s143_s30 }
  0x12   : > { %p475_p10 = scmp.ge.s32.totalorder %s670_s14, 1  ;;  %p171_p11 = scmp.lt.s32.totalorder %s670_s14, 3 }
  0x13   : > { %s131_s4 = scalar_lea.sflag [#allocation5], %s130_s22  ;;  %s672_s5 = smov 128  }
  0x14   : > { %s673_s6 = smov 8   ;;  %p172_p12 = pnand %p475_p10, %p171_p11 }
  0x15   : > { %494 = dma.hbm_to_vmem [thread:$0]  (!%p750_p9), %s142_s28, 512, %s144_s30, %s131_s4, %s672_s5, %s672_s5, %s673_s6  }
  0x16   : > { %s473_s7 = sshll.u32 %s130_s22, 3  ;;  %s474_s8 = sshll.u32 %s666_s13, 3 }
  0x17   : > { %s162_s17 = scalar_lea.hbm %s797_s1, %s474_s8  ;;  %s157_s19 = scalar_lea.vmem [#allocation6], %s473_s7 }
  0x18   : > { %s164_s18 = sshll.u32 %s162_s17, 4  ;;  %s166_s23 = sshll.u32 %s157_s19, 4  ;;  %s165_s18 = int_to_ptr.hbm [resolvable:$true] %s164_s18  ;;  %s167_s23 = int_to_ptr.vmem [resolvable:$true] %s166_s23 }
  0x19   : > { %s154_s24 = scalar_lea.sflag [#allocation7], %s130_s22  ;;  %175 = sbr.rel (%p172_p12) target bundleno = 327 (0x147), region = 28 }
  0x1a   : > { %497 = dma.hbm_to_vmem [thread:$0]  (!%p750_p9), %s165_s18, 128, %s167_s23, %s154_s24  }
  0x1b   : > { %s177_s25 = sand.u32 (!%p172_p12), 1, %s654_s10  }
  0x1c   : > { %s476_s26 = sshll.u32 (!%p172_p12), %s177_s25, 5  ;;  %s178_s27 = scalar_lea.sflag (!%p172_p12), [#allocation5], %s177_s25 }
  0x1d   : > { %s181_s28 = scalar_lea.vmem (!%p172_p12), [#allocation4], %s476_s26 }
  0x1e   : > { %641 = dma.done.wait (%p735_p7), %s178_s27, 512  }
  0x1f   : > { %643 = vsyncadd (%p735_p7), %s178_s27, 4294966784  ;;  %s477_s29 = sshll.u32 %s177_s25, 3  ;;  %s188_s30 = scalar_lea.sflag [#allocation7], %s177_s25 }
  0x20   : > { %s191_s4 = scalar_lea.vmem [#allocation6], %s477_s29 }
  0x21   : > { %645 = dma.done.wait (%p735_p7), %s188_s30, 128  }
  0x22   : > { %647 = vsyncadd (%p735_p7), %s188_s30, 4294967168  ;;  %v229_v0 = vld [vmem:[%s181_s28] sm:$0xff]  ;;  %v230_v1 = vld [vmem:[%s181_s28 + $0x8] sm:$0xff]  ;;  %v674_v6 = vmov 0   ;;  %v675_v11 = vmov 0.0   ;;  %v303_v26 = vlaneseq  ;;  %vm308_vm9 = vcmask 1041409  }
  0x23   : > { %v231_v2 = vld [vmem:[%s181_s28 + $0x10] sm:$0xff]  ;;  %v233_v3 = vld [vmem:[%s191_s4] sm:$0xff]  ;;  %vm234_vm0 = vcmp.gt.f32.partialorder %v230_v1, %v229_v0  ;;  %v232_v4 = vld [vmem:[%s181_s28 + $0x18] sm:$0xff]  ;;  %vm310_vm10 = vcmask 1042434   ;;  %vm313_vm11 = vcmask 59392   ;;  %v676_v46 = vmov 3.0  }
  0x24   : > { %v235_v5 = vsel %vm234_vm0, %v230_v1, %v229_v0  ;;  %v236_v7 = vsel %vm234_vm0, 1, %v674_v6  ;;  %vm245_vm2 = vcmp.eq.s32.totalorder %v233_v3, 1  ;;  %vm275_vm3 = vcmp.eq.s32.totalorder %v233_v3, 3  ;;  %p216_p13 = scmp.lt.s32.totalorder %s662_s12, 1 }
  0x25   : > { %vm237_vm1 = vcmp.gt.f32.partialorder %v231_v2, %v235_v5  ;;  %vm259_vm5 = vcmp.eq.s32.totalorder %v233_v3, 2  ;;  %v479_v12 = vsel %vm245_vm2, 1.0, %v675_v11  ;;  %v483_v13 = vsel %vm275_vm3, 1.0, %v675_v11 }
  0x26   : > { %v238_v8 = vsel %vm237_vm1, %v231_v2, %v235_v5  ;;  %v239_v9 = vsel %vm237_vm1, 2, %v236_v7  ;;  %v481_v16 = vsel %vm259_vm5, 1.0, %v675_v11  ;;  %v304_v28 = vand.u32 127, %v303_v26  ;;  %s810_s12 = smov (!%p216_p13, %s662_s12), 1 }
  0x27   : > { %vm240_vm4 = vcmp.gt.f32.partialorder %v232_v4, %v238_v8  ;;  %vm355_vm0 = vcmask 1042432   ;;  %s218_s3 = scalar_lea.vmem %s798_s2, %s810_s12  ;;  %vm371_vm2 = vcmask 0  }
  0x28   : > { %v241_v10 = vsel %vm240_vm4, 3, %v239_v9 }
  0x29   : > { %vm242_vm6 = vcmp.eq.s32.totalorder %v241_v10, 1  ;;  %vm256_vm7 = vcmp.eq.s32.totalorder %v241_v10, 2  ;;  %vm272_vm8 = vcmp.eq.s32.totalorder %v241_v10, 3 }
  0x2a   : > { %v478_v14 = vsel %vm242_vm6, 1.0, %v675_v11  ;;  %v480_v15 = vsel %vm256_vm7, 1.0, %v675_v11  ;;  %v482_v17 = vsel %vm272_vm8, 1.0, %v675_v11 }
  0x2b   : > { %v253_v18 = vadd.f32 %v479_v12, %v478_v14  ;;  %v285_v19 = vadd.f32 %v483_v13, %v482_v17  ;;  %v264_v20 = vmul.f32 %v481_v16, %v480_v15  ;;  %v269_v21 = vadd.f32 %v481_v16, %v480_v15 }
  0x2c   : > { %v249_v22 = vmul.f32 %v479_v12, %v478_v14  ;;  %v280_v23 = vmul.f32 %v483_v13, %v482_v17 }
  0x2d   : > { %320 = vadd.xlane.f32.xlu0 %v253_v18  ;;  %324 = vadd.xlane.f32.xlu1 %v285_v19 }
  0x2e   : > { %296 = vadd.xlane.f32.xlu2 %v264_v20 }
  0x35   : > { %322 = vadd.xlane.f32.xlu0 %v269_v21  ;;  %294 = vadd.xlane.f32.xlu1 %v249_v22 }
  0x36   : > { %298 = vadd.xlane.f32.xlu2 %v280_v23 }
  0xa0   : > { %v321_v24 = vpop.xlane.xlu0 %320  ;;  %v325_v25 = vpop.xlane.xlu1 %324 }
  0xa1   : > { %v297_v27 = vpop.xlane.xlu2 %296  ;;  %v331_v31 = vperm.slane %v325_v25, %v304_v28  ;;  %v329_v33 = vperm.slane %v321_v24, %v304_v28 }
  0xa2   : > { %v306_v29 = vperm.slane %v297_v27, %v304_v28 }
  0xa8   : > { %v323_v30 = vpop.xlane.xlu0 %322  ;;  %v295_v32 = vpop.xlane.xlu1 %294 }
  0xa9   : > { %v330_v34 = vperm.slane %v323_v30, %v304_v28  ;;  %v305_v35 = vperm.slane %v295_v32, %v304_v28  ;;  %v299_v36 = vpop.xlane.xlu2 %298 }
  0xaa   : > { %v307_v37 = vperm.slane %v299_v36, %v304_v28 }
  0xab   : > { %v332_v38 = vsel %vm308_vm9, %v330_v34, %v329_v33  ;;  %v309_v39 = vsel %vm308_vm9, %v306_v29, %v305_v35 }
  0xac   : > { %v333_v40 = vsel %vm310_vm10, %v331_v31, %v332_v38  ;;  %v311_v41 = vsel %vm310_vm10, %v307_v37, %v309_v39 }
  0xad   : > { %v335_v42 = vsel %vm313_vm11, %v333_v40, 0.0  ;;  %v314_v43 = vsel %vm313_vm11, %v311_v41, 0.0 }
  0xae   : > { %336 = vadd.xlane.f32.xlu0 %v335_v42  ;;  %315 = vadd.xlane.f32.xlu1 %v314_v43 }
 0x121   : > { %v337_v44 = vpop.xlane.xlu0 %336  ;;  %v316_v54 = vpop.xlane.xlu1 %315 }
 0x122   : > { %v339_v45 = vadd.f32 1e-05, %v337_v44  ;;  %v338_v59 = vmul.f32 2.0, %v316_v54 }
 0x124   : > { %552 = vrcp.f32 %v339_v45  ;;  %v351_v51 = vand.u32 2147483648, %v339_v45  ;;  %v349_v53 = vand.u32 2147483647, %v339_v45  ;;  %vm345_vm13 = vweird.f32 %v339_v45 }
 0x125   : > { %554 = vrcp.f32 %v676_v46 }
 0x126   : > { %v352_v57 = vor.u32 1.1754944e-38, %v351_v51  ;;  %vm350_vm15 = vcmp.eq.f32.partialorder %v349_v53, 8.507059e+37 }
 0x12a   : > { %v553_v47 = vpop.eup %552 }
 0x12b   : > { %v341_v48 = vmul.f32 %v553_v47, %v339_v45  ;;  %v555_v50 = vpop.eup %554  ;;  %vm346_vm12 = vweird.f32 %v553_v47 }
 0x12c   : > { %v364_v56 = vmul.f32 3.0, %v555_v50  ;;  %vm347_vm14 = vmor %vm345_vm13, %vm346_vm12  ;;  %vm368_vm1 = vweird.f32 %v555_v50 }
 0x12d   : > { %v342_v49 = vsub.f32 1.0, %v341_v48 }
 0x12e   : > { %v365_v61 = vsub.f32 1.0, %v364_v56 }
 0x12f   : > { %v343_v52 = vmul.f32 %v553_v47, %v342_v49 }
 0x130   : > { %v366_v1 = vmul.f32 %v555_v50, %v365_v61 }
 0x131   : > { %v344_v55 = vadd.f32 %v553_v47, %v343_v52 }
 0x132   : > { %v367_v4 = vadd.f32 %v555_v50, %v366_v1 }
 0x133   : > { %v348_v58 = vsel %vm347_vm14, %v553_v47, %v344_v55 }
 0x134   : > { %v353_v60 = vsel %vm350_vm15, %v352_v57, %v348_v58  ;;  %v369_v7 = vsel %vm368_vm1, %v555_v50, %v367_v4 }
 0x135   : > { %v354_v62 = vmul.f32 %v353_v60, %v338_v59 }
 0x137   : > { %v356_v63 = vsel %vm355_vm0, %v354_v62, 0.0 }
 0x138   : > { %v357_v0 = vrot.slane %v356_v63, 4 }
 0x13a   : > { %v358_v2 = vadd.f32 %v357_v0, %v356_v63 }
 0x13c   : > { %v359_v3 = vrot.slane %v358_v2, 2 }
 0x13e   : > { %v360_v5 = vadd.f32 %v359_v3, %v358_v2 }
 0x140   : > { %v361_v6 = vrot.slane %v360_v5, 1 }
 0x142   : > { %v362_v8 = vadd.f32 %v361_v6, %v360_v5 }
 0x144   : > { %v370_v9 = vmul.f32 %v369_v7, %v362_v8 }
 0x146   : > { %372 = vst.msk [vmem:[%s218_s3] sm:$0x1] %vm371_vm2, %v370_v9 }
 0x147 PF: > { %s18_s14 = sadd.s32 1, %s670_s14   ;;  %s802_s9 = smov %s654_s10 }
 0x148   : > { %p15_p0 = scmp.ge.s32.totalorder %s18_s14, 4   ;;  %s803_s10 = smov %s658_s11 }
 0x149   : > { %s804_s11 = smov %s741_s21  ;;  %s805_s12 = smov %s666_s13 }
 0x14a   : > { %s806_s13 = smov %s808_s16  ;;  %17 = sbr.rel (!%p15_p0) target bundleno = 6 (0x6), region = 93 }
 0x14f   :  { %390 = vsyncpa [#allocation5], 1 }
 0x150   :  { %392 = vsyncpa [#allocation5 + $0x1], 1 }
 0x151   :  { %393 = vsyncpa [#allocation7], 1 }
 0x152   :  { %395 = vsyncpa [#allocation7 + $0x1], 1 }

</bundles_post_ra>
